<compile_context>
chip_gen: v5e
topology: v5e:2x2
jax: 0.10.0
libtpu: 0.0.40
codegen_flags: <defaults>
</compile_context>

<pallas_src>
import functools
import math

import jax
import jax.numpy as jnp
from jax.experimental import pallas as pl
from jax.experimental.pallas import tpu as pltpu

_MIB = 1024 * 1024


def _make_kl_kernel(total_rows, total_cols, tm, th, mask_rows, mask_cols):
    """Build the kernel body with static shape/config baked in."""

    def kernel(mu_q_ref, sig_q_ref, mu_p_ref, sig_p_ref, out_ref):
        mu_q = mu_q_ref[...].astype(jnp.float32)
        sig_q = sig_q_ref[...].astype(jnp.float32)
        mu_p = mu_p_ref[...].astype(jnp.float32)
        sig_p = sig_p_ref[...].astype(jnp.float32)

        # KL(N(mu_q, sig_q) || N(mu_p, sig_p)) elementwise with only 2 EUP ops:
        #   = log(sig_p/sig_q) + (sig_q^2 + diff^2) / (2 sig_p^2) - 0.5
        #   = (sig_q^2 + diff^2) * 0.5 * inv_p^2 - log(sig_q * inv_p) - 0.5
        inv_p = pl.reciprocal(sig_p, approx=False)          # EUP
        diff = mu_q - mu_p
        kl = ((sig_q * sig_q + diff * diff) * (0.5 * (inv_p * inv_p))
              - jnp.log(sig_q * inv_p)                      # EUP
              - jnp.float32(0.5))

        # Ragged-edge handling: padded rows/cols hold undefined data; compute KL
        # unconditionally and zero their contribution with a single select.
        if mask_rows or mask_cols:
            valid = None
            if mask_rows:
                row = (jax.lax.broadcasted_iota(jnp.int32, (tm, 1), 0)
                       + pl.program_id(0) * tm)
                valid = row < total_rows
            if mask_cols:
                col = (jax.lax.broadcasted_iota(jnp.int32, (1, th), 1)
                       + pl.program_id(1) * th)
                cvalid = col < total_cols
                valid = cvalid if valid is None else jnp.logical_and(valid, cvalid)
            kl = jnp.where(valid, kl, jnp.float32(0.0))

        # Per-tile partial sum (lane reduce then sublane reduce), written as a
        # lane-dense (8, 128) broadcast into this step's private output block.
        partial = jnp.sum(kl, axis=1, keepdims=True)        # (tm, 1)
        partial = jnp.sum(partial, axis=0, keepdims=True)   # (1, 1)
        out_ref[...] = jnp.broadcast_to(partial, (8, 128)).astype(jnp.float32)

    return kernel


def _vmem_capacity_bytes():
    """Physical VMEM of the current TPU generation (conservative fallback)."""
    try:
        return int(pltpu.get_tpu_info().vmem_capacity_bytes)
    except Exception:
        return 64 * _MIB  # v7x-sized conservative default


@functools.partial(jax.jit, static_argnames=("tm", "th", "param_dtype"))
def kl_loss(mu_q, sigma_q, mu_p, sigma_p, *, tm=None, th=None, param_dtype=None):
    """Mean KL divergence KL(Normal(mu_q, sigma_q) || Normal(mu_p, sigma_p))."""
    assert mu_q.shape == sigma_q.shape == mu_p.shape == sigma_p.shape
    n_elems = mu_q.size
    assert n_elems > 0

    # Flatten arbitrary-rank parameters to [rows, hidden].
    if mu_q.ndim <= 1:
        shape2d = (1, int(n_elems))
    else:
        shape2d = (int(math.prod(mu_q.shape[:-1])), int(mu_q.shape[-1]))

    def prep(x):
        x = x.reshape(shape2d)
        return x.astype(param_dtype) if param_dtype is not None else x

    mu_q, sigma_q, mu_p, sigma_p = map(prep, (mu_q, sigma_q, mu_p, sigma_p))
    B, H = shape2d
    itemsize = jnp.dtype(mu_q.dtype).itemsize

    # Generation-aware budgets: ~48 MiB working set on v5e/v6e (128 MiB VMEM),
    # ~40 MiB on v7x (64 MiB VMEM); scoped VMEM limit raised accordingly.
    phys_vmem = _vmem_capacity_bytes()
    budget = 48 * _MIB if phys_vmem >= 96 * _MIB else 40 * _MIB
    vmem_limit = int(max(32 * _MIB, min(phys_vmem - 16 * _MIB, budget + 16 * _MIB)))

    # --- tile sizing -------------------------------------------------------
    TH_MAX = 2048                       # column-tile cap (multiple of 128)
    granule = max(8, 32 // itemsize)    # sublane packing granule (8 f32 / 16 bf16)

    if th is None:
        th = H if H <= TH_MAX else TH_MAX
    else:
        th = H if int(th) >= H else max(128, (int(th) // 128) * 128)

    if tm is None:
        # 4 inputs x 2 pipeline buffers per row of a tile.
        bytes_per_row = th * itemsize * 8
        tm = max(granule, (int(budget // bytes_per_row) // granule) * granule)
        if tm >= B:
            tm = B                      # full-dim block is always legal
    else:
        tm = B if int(tm) >= B else max(granule, (int(tm) // granule) * granule)

    gb = (B + tm - 1) // tm
    gh = (H + th - 1) // th
    mask_rows = (B % tm) != 0
    mask_cols = (H % th) != 0

    kernel = _make_kl_kernel(B, H, tm, th, mask_rows, mask_cols)
    in_blk = pl.BlockSpec((tm, th), lambda i, j: (i, j))

    # Per-step partial sums: one lane-dense (8,128) block per grid step.
    partial_slab = pl.pallas_call(
        kernel,
        out_shape=jax.ShapeDtypeStruct((gb * 8, gh * 128), jnp.float32),
        grid_spec=pltpu.PrefetchScalarGridSpec(
            num_scalar_prefetch=0,
            grid=(gb, gh),
            in_specs=[in_blk, in_blk, in_blk, in_blk],
            out_specs=pl.BlockSpec((8, 128), lambda i, j: (i, j)),
        ),
        compiler_params=pltpu.CompilerParams(
            dimension_semantics=("parallel", "parallel"),
            vmem_limit_bytes=vmem_limit,
        ),
    )(mu_q, sigma_q, mu_p, sigma_p)

    # Tiny final reduction + 1/N normalization in the wrapper (plain XLA).
    partials = partial_slab[::8, ::128]          # (gb, gh) partial sums
    return jnp.sum(partials) * jnp.float32(1.0 / float(n_elems))


def _kl_loss_ref(mu_q, sigma_q, mu_p, sigma_p):
    """Pure-JAX reference (mirrors torch.distributions.kl_divergence for Normals)."""
    mu_q = mu_q.astype(jnp.float32)
    mu_p = mu_p.astype(jnp.float32)
    sigma_q = sigma_q.astype(jnp.float32)
    sigma_p = sigma_p.astype(jnp.float32)
    var_q = sigma_q ** 2
    var_p = sigma_p ** 2
    kl = (jnp.log(sigma_p) - jnp.log(sigma_q)
          + (var_q + (mu_q - mu_p) ** 2) / (2.0 * var_p)
          - 0.5)
    return jnp.mean(kl)


if __name__ == "__main__":
    key = jax.random.PRNGKey(0)

    def make_inputs(k, shape):
        k1, k2, k3, k4 = jax.random.split(k, 4)
        mu_q = jax.random.normal(k1, shape, dtype=jnp.float32)
        mu_p = jax.random.normal(k2, shape, dtype=jnp.float32)
        # Scales must be strictly positive.
        sigma_q = jax.nn.softplus(jax.random.normal(k3, shape, dtype=jnp.float32)) + 1e-3
        sigma_p = jax.nn.softplus(jax.random.normal(k4, shape, dtype=jnp.float32)) + 1e-3
        return mu_q, sigma_q, mu_p, sigma_p

    ka, kb, kc = jax.random.split(key, 3)

    # Case 1: ragged row tiles (B=40, tm=16 -> grid rows = 3, 8 masked rows).
    p1 = make_inputs(ka, (40, 256))
    out1 = jax.block_until_ready(kl_loss(*p1, tm=16))
    ref1 = _kl_loss_ref(*p1)
    assert jnp.allclose(out1, ref1, rtol=1e-4, atol=1e-5), (out1, ref1)

    # Case 2: auto tile sizing (single full-array tile), f32 and bf16-cast paths.
    p2 = make_inputs(kb, (64, 128))
    out2 = jax.block_until_ready(kl_loss(*p2))
    ref2 = _kl_loss_ref(*p2)
    assert jnp.allclose(out2, ref2, rtol=1e-4, atol=1e-5), (out2, ref2)
    out2b = jax.block_until_ready(kl_loss(*p2, param_dtype=jnp.bfloat16))
    assert jnp.allclose(out2b, ref2, rtol=5e-2, atol=1e-3), (out2b, ref2)

    # Case 3: 2-D grid with ragged tiles on both axes (row + column masking).
    p3 = make_inputs(kc, (24, 320))
    out3 = jax.block_until_ready(kl_loss(*p3, tm=16, th=128))
    ref3 = _kl_loss_ref(*p3)
    assert jnp.allclose(out3, ref3, rtol=1e-4, atol=1e-5), (out3, ref3)

    print("KERNEL_OK")
</pallas_src>

<mosaic_0001>
module attributes {stable_mosaic.version = 11 : i64} {
  func.func @kernel(%arg0: i32, %arg1: i32, %arg2: memref<16x256xf32, #tpu.memory_space<vmem>>, %arg3: memref<16x256xf32, #tpu.memory_space<vmem>>, %arg4: memref<16x256xf32, #tpu.memory_space<vmem>>, %arg5: memref<16x256xf32, #tpu.memory_space<vmem>>, %arg6: memref<8x128xf32, #tpu.memory_space<vmem>>) attributes {dimension_semantics = [#tpu.dimension_semantics<parallel>, #tpu.dimension_semantics<parallel>], iteration_bounds = array<i64: 3, 1>, scalar_prefetch = 0 : i64, scratch_operands = 0 : i64, tpu.core_type = #tpu.core_type<tc>, window_params = [{transform_indices = @transform_0, window_bounds = array<i64: 16, 256>}, {transform_indices = @transform_1, window_bounds = array<i64: 16, 256>}, {transform_indices = @transform_2, window_bounds = array<i64: 16, 256>}, {transform_indices = @transform_3, window_bounds = array<i64: 16, 256>}, {transform_indices = @transform_4, window_bounds = array<i64: 8, 128>}]} {
    %c0 = arith.constant 0 : index
    %c0_0 = arith.constant 0 : index
    %0 = vector.load %arg2[%c0, %c0_0] : memref<16x256xf32, #tpu.memory_space<vmem>>, vector<16x256xf32>
    %c0_1 = arith.constant 0 : index
    %c0_2 = arith.constant 0 : index
    %1 = vector.load %arg3[%c0_1, %c0_2] : memref<16x256xf32, #tpu.memory_space<vmem>>, vector<16x256xf32>
    %c0_3 = arith.constant 0 : index
    %c0_4 = arith.constant 0 : index
    %2 = vector.load %arg4[%c0_3, %c0_4] : memref<16x256xf32, #tpu.memory_space<vmem>>, vector<16x256xf32>
    %c0_5 = arith.constant 0 : index
    %c0_6 = arith.constant 0 : index
    %3 = vector.load %arg5[%c0_5, %c0_6] : memref<16x256xf32, #tpu.memory_space<vmem>>, vector<16x256xf32>
    %4 = tpu.reciprocal %3 : vector<16x256xf32> -> vector<16x256xf32>
    %5 = arith.subf %0, %2 : vector<16x256xf32>
    %6 = arith.mulf %1, %1 : vector<16x256xf32>
    %7 = arith.mulf %5, %5 : vector<16x256xf32>
    %8 = arith.addf %6, %7 : vector<16x256xf32>
    %9 = arith.mulf %4, %4 : vector<16x256xf32>
    %cst = arith.constant 5.000000e-01 : f32
    %10 = vector.broadcast %cst : f32 to vector<16x256xf32>
    %11 = arith.mulf %10, %9 : vector<16x256xf32>
    %12 = arith.mulf %8, %11 : vector<16x256xf32>
    %13 = arith.mulf %1, %4 : vector<16x256xf32>
    %14 = math.log %13 : vector<16x256xf32>
    %15 = arith.subf %12, %14 : vector<16x256xf32>
    %cst_7 = arith.constant 5.000000e-01 : f32
    %16 = vector.broadcast %cst_7 : f32 to vector<16x256xf32>
    %17 = arith.subf %15, %16 : vector<16x256xf32>
    %18 = tpu.iota {dimensions = array<i32: 0>} : vector<16x1xi32>
    %c16_i32 = arith.constant 16 : i32
    %19 = arith.muli %arg0, %c16_i32 : i32
    %20 = vector.broadcast %19 : i32 to vector<16x1xi32>
    %21 = arith.addi %18, %20 : vector<16x1xi32>
    %c40_i32 = arith.constant 40 : i32
    %22 = vector.broadcast %c40_i32 : i32 to vector<16x1xi32>
    %23 = arith.cmpi slt, %21, %22 : vector<16x1xi32>
    %cst_8 = arith.constant 0.000000e+00 : f32
    %24 = vector.shape_cast %23 : vector<16x1xi1> to vector<16x1xi1>
    %25 = vector.broadcast %24 : vector<16x1xi1> to vector<16x256xi1>
    %26 = vector.broadcast %cst_8 : f32 to vector<16x256xf32>
    %27 = arith.select %25, %17, %26 : vector<16x256xi1>, vector<16x256xf32>
    %cst_9 = arith.constant dense<0.000000e+00> : vector<16xf32>
    %28 = vector.multi_reduction <add>, %27, %cst_9 [1] : vector<16x256xf32> to vector<16xf32>
    %29 = vector.shape_cast %28 : vector<16xf32> to vector<16x1xf32>
    %cst_10 = arith.constant dense<0.000000e+00> : vector<1xf32>
    %30 = vector.multi_reduction <add>, %29, %cst_10 [0] : vector<16x1xf32> to vector<1xf32>
    %31 = vector.shape_cast %30 : vector<1xf32> to vector<1x1xf32>
    %32 = vector.shape_cast %31 : vector<1x1xf32> to vector<1x1xf32>
    %33 = vector.broadcast %32 : vector<1x1xf32> to vector<8x128xf32>
    %c0_11 = arith.constant 0 : index
    %c0_12 = arith.constant 0 : index
    %34 = vector.load %arg6[%c0_11, %c0_12] : memref<8x128xf32, #tpu.memory_space<vmem>>, vector<8x128xf32>
    tpu.vector_store %arg6[%c0_11, %c0_12], %33 {strides = array<i32>} : memref<8x128xf32, #tpu.memory_space<vmem>>, vector<8x128xf32>,
    return
  }
  func.func @transform_0(%arg0: i32, %arg1: i32) -> (i32, i32) {
    %c0_i32 = arith.constant 0 : i32
    return %arg0, %arg1 : i32, i32
  }
  func.func @transform_1(%arg0: i32, %arg1: i32) -> (i32, i32) {
    %c0_i32 = arith.constant 0 : i32
    return %arg0, %arg1 : i32, i32
  }
  func.func @transform_2(%arg0: i32, %arg1: i32) -> (i32, i32) {
    %c0_i32 = arith.constant 0 : i32
    return %arg0, %arg1 : i32, i32
  }
  func.func @transform_3(%arg0: i32, %arg1: i32) -> (i32, i32) {
    %c0_i32 = arith.constant 0 : i32
    return %arg0, %arg1 : i32, i32
  }
  func.func @transform_4(%arg0: i32, %arg1: i32) -> (i32, i32) {
    %c0_i32 = arith.constant 0 : i32
    return %arg0, %arg1 : i32, i32
  }
}

</mosaic_0001>

<bundles_post_ra>
// kernel: kl_loss.1
= control target key start
LH: loop header
LB: loop body
LE: loop exit
PB: predicated region body
PF: predicated region fallthrough
CT: control target
= control target key end

     0   :  { %9 = vsyncpa [#allocation3], 0  ;;  %s1519_s0 = inlined_call_operand.hbm [shape: f32[40,256], index: 0, kind: input, shape index: {}]   ;;  %s1520_s1 = inlined_call_operand.hbm [shape: f32[40,256], index: 1, kind: input, shape index: {}]   ;;  %s1521_s2 = inlined_call_operand.hbm [shape: f32[40,256], index: 2, kind: input, shape index: {}]   ;;  %s1522_s3 = inlined_call_operand.hbm [shape: f32[40,256], index: 3, kind: input, shape index: {}]   ;;  %s1523_s4 = inlined_call_operand.vmem [shape: f32[24,128], index: 4, kind: output, shape index: {}]  }
   0x1   :  { %11 = vsyncpa [#allocation3 + $0x1], 0 }
   0x2   :  { %12 = vsyncpa [#allocation5], 0 }
   0x3   :  { %14 = vsyncpa [#allocation5 + $0x1], 0 }
   0x4   :  { %15 = vsyncpa [#allocation8], 0 }
   0x5   :  { %17 = vsyncpa [#allocation8 + $0x1], 0  ;;  %s1147_s15 = smov 0   ;;  %s1149_s16 = smov 0  }
   0x6   :  { %s1151_s17 = smov 0   ;;  %s1153_s18 = smov 0  }
   0x7   :  { %s1155_s19 = smov 0   ;;  %s1157_s20 = smov 0  }
   0x8 LB: > { %s753_s21 = sadd.s32 4294967295, %s1108_s20   ;;  %s35_s22 = sadd.s32 1, %s1104_s19  ;;  %s1108_s20 = sphi %s1157_s20, %s23_s20   ;;  %s1104_s19 = sphi %s1155_s19, %s1550_s19   ;;  %s1100_s18 = sphi %s1153_s18, %s1549_s18   ;;  %s1096_s17 = sphi %s1151_s17, %s1548_s17   ;;  %s1092_s16 = sphi %s1149_s16, %s1547_s16   ;;  %s1088_s15 = sphi %s1147_s15, %s1546_s15  }
   0x9   : > { %p37_p0 = scmp.ge.s32.totalorder %s35_s22, 3  ;;  %s44_s23 = sadd.s32 1, %s1096_s17 }
   0xa   : > { %p51_p1 = scmp.ne.s32.totalorder %s1096_s17, %s1092_s16  ;;  %p52_p2 = scmp.eq.s32.totalorder %s1108_s20, 0 }
   0xb   : > { %s1552_s22 = smov (%p37_p0, %s35_s22), 0  ;;  %p57_p4 = scmp.ne.s32.totalorder %s1092_s16, %s1088_s15 }
   0xc   : > { %p1183_p3 = por %p52_p2, %p51_p1  ;;  %s39_s25 = ssub.s32 %s1104_s19, %s1552_s22 }
   0xd   : > { %p58_p5 = scmp.eq.s32.totalorder %s753_s21, 0  ;;  %p42_p6 = scmp.eq.s32.totalorder %s39_s25, 0 }
   0xe   : > { %p756_p8 = scmp.ge.s32.totalorder %s1108_s20, 3 }
   0xf   : > { %p1192_p7 = por %p58_p5, %p57_p4 }
  0x10   : > { %s1197_s27 = scalar_select %p42_p6, %s1096_s17, %s44_s23  }
  0x11   : > { %189 = sbr.rel (%p756_p8) target bundleno = 166 (0xa6), region = 16 }
  0x16   : > { %192 = sbr.rel (!%p1183_p3) target bundleno = 58 (0x3a), region = 20  ;;  %s193_s28 = sand.u32 (%p1183_p3), 1, %s1096_s17  }
  0x17   : > { %s758_s29 = sshll.u32 (%p1183_p3), %s1104_s19, 1  ;;  %s757_s30 = sshll.u32 (%p1183_p3), %s193_s28, 5 }
  0x18   : > { %s200_s5 = ssub.s32 (%p1183_p3), 5, %s758_s29  ;;  %s1207_s9 = scalar_lea.sflag (%p1183_p3), [#allocation3], %s193_s28 }
  0x19   : > { %p201_p9 = scmp.lt.s32.totalorder (%p1183_p3), %s200_s5, 2  ;;  %s197_s10 = scalar_lea.vmem (%p1183_p3), [#allocation2], %s757_s30 }
  0x1b   : > { %s1554_s5 = smov (!%p201_p9, %s200_s5), 2 }
  0x1c   : > { %s806_s6 = sshll.u32 %s1554_s5, 4 }
  0x1d   : > { %s205_s7 = ssub.s32 32, %s806_s6 }
  0x1e   : > { %s206_s8 = sshll.u32 %s205_s7, 4 }
  0x1f   : > { %207 = vsyncadd %s1207_s9, %s206_s8  ;;  %p1210_p10 = scmp.ne.s32.totalorder %s806_s6, 0  ;;  %s808_s12 = sshll.u32 %s1104_s19, 5 }
  0x20   : > { %s212_s15 = scalar_lea.hbm %s1519_s0, %s808_s12  ;;  %s1218_s23 = sshll.u32 %s197_s10, 4  ;;  %s217_s23 = int_to_ptr.vmem [resolvable:$true] %s1218_s23 }
  0x21   : > { %s214_s25 = sshll.u32 %s212_s15, 4  ;;  %s765_s28 = sshll.u32 %s1554_s5, 8  ;;  %s1221_s25 = int_to_ptr.hbm [resolvable:$true] %s214_s25 }
  0x22   : > { %s894_s29 = sshra.s32 %s1221_s25, 4  ;;  %s896_s30 = sshrl.u32 %s765_s28, 4  ;;  %s895_s29 = int_to_ptr.hbm [resolvable:$true] %s894_s29 }
  0x23   : > { %s901_s6 = scalar_lea.hbm %s895_s29, %s896_s30  ;;  %s905_s10 = scalar_lea.hbm %s1519_s0, 80 }
  0x24   : > { %p902_p11 = scmp.ne.s32.totalorder %s895_s29, %s901_s6  ;;  %p907_p0 = scmp.lt.s32.totalorder %s905_s10, %s901_s6 }
  0x26   : > { %p903_p12 = pnand %p902_p11, %p1210_p10 }
  0x28   : > { %p904_p13 = pneg %p903_p12 }
  0x2a   : > { %p909_p1 = pnand %p907_p0, %p904_p13 }
  0x2c   : > { %912 = shalt.err (!%p909_p1)
}
  0x2d   : > { %s913_s12 = sshra.s32 %s217_s23, 4  ;;  %s1110_s14 = smov [#allocation2]   ;;  %s914_s12 = int_to_ptr.vmem [resolvable:$true] %s913_s12 }
  0x2e   : > { %s920_s13 = scalar_lea.vmem %s914_s12, %s896_s30  ;;  %s924_s15 = scalar_lea.vmem %s1110_s14, 64 }
  0x2f   : > { %p921_p2 = scmp.ne.s32.totalorder %s914_s12, %s920_s13  ;;  %p926_p6 = scmp.lt.s32.totalorder %s924_s15, %s920_s13 }
  0x31   : > { %p922_p4 = pnand %p921_p2, %p1210_p10 }
  0x33   : > { %p923_p5 = pneg %p922_p4 }
  0x35   : > { %p928_p8 = pnand %p926_p6, %p923_p5 }
  0x37   : > { %931 = shalt.err (!%p928_p8)
}
  0x38   : > { %s1111_s29 = smov 256   ;;  %s1112_s6 = smov 16  }
  0x39   : > { %222 = dma.hbm_to_vmem [thread:$0]  (%p1210_p10), %s1221_s25, %s765_s28, %s217_s23, %s1207_s9, %s1111_s29, %s1111_s29, %s1112_s6  }
  0x3a PF: > { %225 = sbr.rel (!%p1183_p3) target bundleno = 94 (0x5e), region = 24  ;;  %s226_s30 = sand.u32 (%p1183_p3), 1, %s1108_s20  }
  0x3b   : > { %s228_s7 = sand.u32 (%p1183_p3), 1, %s1096_s17   ;;  %s767_s10 = sshll.u32 (%p1183_p3), %s1104_s19, 1 }
  0x3c   : > { %s766_s8 = sshll.u32 (%p1183_p3), %s228_s7, 5  ;;  %s233_s12 = ssub.s32 (%p1183_p3), 5, %s767_s10 }
  0x3d   : > { %p234_p9 = scmp.lt.s32.totalorder (%p1183_p3), %s233_s12, 2  ;;  %s1252_s9 = scalar_lea.sflag (%p1183_p3), [#allocation5], %s226_s30 }
  0x3e   : > { %s230_s23 = scalar_lea.vmem (%p1183_p3), [#allocation4], %s766_s8 }
  0x3f   : > { %s1556_s12 = smov (!%p234_p9, %s233_s12), 2 }
  0x40   : > { %s809_s11 = sshll.u32 %s1556_s12, 4 }
  0x41   : > { %s238_s13 = ssub.s32 32, %s809_s11 }
  0x42   : > { %s239_s5 = sshll.u32 %s238_s13, 4 }
  0x43   : > { %240 = vsyncadd %s1252_s9, %s239_s5  ;;  %p1255_p10 = scmp.ne.s32.totalorder %s809_s11, 0  ;;  %s811_s28 = sshll.u32 %s1104_s19, 5 }
  0x44   : > { %s245_s29 = scalar_lea.hbm %s1520_s1, %s811_s28  ;;  %s1263_s6 = sshll.u32 %s230_s23, 4  ;;  %s250_s6 = int_to_ptr.vmem [resolvable:$true] %s1263_s6 }
  0x45   : > { %s247_s30 = sshll.u32 %s245_s29, 4  ;;  %s774_s7 = sshll.u32 %s1556_s12, 8  ;;  %s1266_s30 = int_to_ptr.hbm [resolvable:$true] %s247_s30 }
  0x46   : > { %s933_s8 = sshra.s32 %s1266_s30, 4  ;;  %s935_s10 = sshrl.u32 %s774_s7, 4  ;;  %s934_s8 = int_to_ptr.hbm [resolvable:$true] %s933_s8 }
  0x47   : > { %s940_s11 = scalar_lea.hbm %s934_s8, %s935_s10  ;;  %s944_s23 = scalar_lea.hbm %s1520_s1, 80 }
  0x48   : > { %p941_p11 = scmp.ne.s32.totalorder %s934_s8, %s940_s11  ;;  %p946_p0 = scmp.lt.s32.totalorder %s944_s23, %s940_s11 }
  0x4a   : > { %p942_p12 = pnand %p941_p11, %p1255_p10 }
  0x4c   : > { %p943_p13 = pneg %p942_p12 }
  0x4e   : > { %p948_p1 = pnand %p946_p0, %p943_p13 }
  0x50   : > { %951 = shalt.err (!%p948_p1)
}
  0x51   : > { %s952_s28 = sshra.s32 %s250_s6, 4  ;;  %s1113_s15 = smov [#allocation4]   ;;  %s953_s28 = int_to_ptr.vmem [resolvable:$true] %s952_s28 }
  0x52   : > { %s959_s14 = scalar_lea.vmem %s953_s28, %s935_s10  ;;  %s963_s29 = scalar_lea.vmem %s1113_s15, 64 }
  0x53   : > { %p960_p2 = scmp.ne.s32.totalorder %s953_s28, %s959_s14  ;;  %p965_p6 = scmp.lt.s32.totalorder %s963_s29, %s959_s14 }
  0x55   : > { %p961_p4 = pnand %p960_p2, %p1255_p10 }
  0x57   : > { %p962_p5 = pneg %p961_p4 }
  0x59   : > { %p967_p8 = pnand %p965_p6, %p962_p5 }
  0x5b   : > { %970 = shalt.err (!%p967_p8)
}
  0x5c   : > { %s1114_s8 = smov 256   ;;  %s1115_s11 = smov 16  }
  0x5d   : > { %255 = dma.hbm_to_vmem [thread:$0]  (%p1255_p10), %s1266_s30, %s774_s7, %s250_s6, %s1252_s9, %s1114_s8, %s1114_s8, %s1115_s11  }
  0x5e PF: > { %258 = sbr.rel (!%p1183_p3) target bundleno = 130 (0x82), region = 28  ;;  %s259_s10 = sand.u32 (%p1183_p3), 1, %s1108_s20  }
  0x5f   : > { %s261_s13 = sand.u32 (%p1183_p3), 1, %s1096_s17   ;;  %s776_s23 = sshll.u32 (%p1183_p3), %s1104_s19, 1 }
  0x60   : > { %s775_s5 = sshll.u32 (%p1183_p3), %s261_s13, 5  ;;  %s266_s28 = ssub.s32 (%p1183_p3), 5, %s776_s23 }
  0x61   : > { %p267_p9 = scmp.lt.s32.totalorder (%p1183_p3), %s266_s28, 2  ;;  %s1297_s9 = scalar_lea.sflag (%p1183_p3), [#allocation5], %s259_s10 }
  0x62   : > { %s263_s6 = scalar_lea.vmem (%p1183_p3), [#allocation6], %s775_s5 }
  0x63   : > { %s1558_s28 = smov (!%p267_p9, %s266_s28), 2 }
  0x64   : > { %s812_s25 = sshll.u32 %s1558_s28, 4 }
  0x65   : > { %s271_s14 = ssub.s32 32, %s812_s25 }
  0x66   : > { %s272_s12 = sshll.u32 %s271_s14, 4 }
  0x67   : > { %273 = vsyncadd %s1297_s9, %s272_s12  ;;  %p1300_p10 = scmp.ne.s32.totalorder %s812_s25, 0  ;;  %s814_s7 = sshll.u32 %s1104_s19, 5 }
  0x68   : > { %s278_s8 = scalar_lea.hbm %s1521_s2, %s814_s7  ;;  %s1308_s11 = sshll.u32 %s263_s6, 4  ;;  %s283_s11 = int_to_ptr.vmem [resolvable:$true] %s1308_s11 }
  0x69   : > { %s280_s10 = sshll.u32 %s278_s8, 4  ;;  %s783_s13 = sshll.u32 %s1558_s28, 8  ;;  %s1311_s10 = int_to_ptr.hbm [resolvable:$true] %s280_s10 }
  0x6a   : > { %s972_s5 = sshra.s32 %s1311_s10, 4  ;;  %s974_s23 = sshrl.u32 %s783_s13, 4  ;;  %s973_s5 = int_to_ptr.hbm [resolvable:$true] %s972_s5 }
  0x6b   : > { %s979_s25 = scalar_lea.hbm %s973_s5, %s974_s23  ;;  %s983_s6 = scalar_lea.hbm %s1521_s2, 80 }
  0x6c   : > { %p980_p11 = scmp.ne.s32.totalorder %s973_s5, %s979_s25  ;;  %p985_p0 = scmp.lt.s32.totalorder %s983_s6, %s979_s25 }
  0x6e   : > { %p981_p12 = pnand %p980_p11, %p1300_p10 }
  0x70   : > { %p982_p13 = pneg %p981_p12 }
  0x72   : > { %p987_p1 = pnand %p985_p0, %p982_p13 }
  0x74   : > { %990 = shalt.err (!%p987_p1)
}
  0x75   : > { %s991_s7 = sshra.s32 %s283_s11, 4  ;;  %s1116_s29 = smov [#allocation6]   ;;  %s992_s7 = int_to_ptr.vmem [resolvable:$true] %s991_s7 }
  0x76   : > { %s998_s15 = scalar_lea.vmem %s992_s7, %s974_s23  ;;  %s1002_s8 = scalar_lea.vmem %s1116_s29, 64 }
  0x77   : > { %p999_p2 = scmp.ne.s32.totalorder %s992_s7, %s998_s15  ;;  %p1004_p6 = scmp.lt.s32.totalorder %s1002_s8, %s998_s15 }
  0x79   : > { %p1000_p4 = pnand %p999_p2, %p1300_p10 }
  0x7b   : > { %p1001_p5 = pneg %p1000_p4 }
  0x7d   : > { %p1006_p8 = pnand %p1004_p6, %p1001_p5 }
  0x7f   : > { %1009 = shalt.err (!%p1006_p8)
}
  0x80   : > { %s1117_s5 = smov 256   ;;  %s1118_s25 = smov 16  }
  0x81   : > { %288 = dma.hbm_to_vmem [thread:$0]  (%p1300_p10), %s1311_s10, %s783_s13, %s283_s11, %s1297_s9, %s1117_s5, %s1117_s5, %s1118_s25  }
  0x82 PF: > { %291 = sbr.rel (!%p1183_p3) target bundleno = 166 (0xa6), region = 32  ;;  %s292_s23 = sand.u32 (%p1183_p3), 1, %s1096_s17  }
  0x83   : > { %s785_s14 = sshll.u32 (%p1183_p3), %s1104_s19, 1  ;;  %s784_s12 = sshll.u32 (%p1183_p3), %s292_s23, 5 }
  0x84   : > { %s299_s6 = ssub.s32 (%p1183_p3), 5, %s785_s14  ;;  %s1341_s29 = scalar_lea.sflag (%p1183_p3), [#allocation8], %s292_s23 }
  0x85   : > { %p300_p9 = scmp.lt.s32.totalorder (%p1183_p3), %s299_s6, 2  ;;  %s296_s28 = scalar_lea.vmem (%p1183_p3), [#allocation7], %s784_s12 }
  0x87   : > { %s1560_s6 = smov (!%p300_p9, %s299_s6), 2 }
  0x88   : > { %s815_s7 = sshll.u32 %s1560_s6, 4 }
  0x89   : > { %s304_s15 = ssub.s32 32, %s815_s7 }
  0x8a   : > { %s305_s30 = sshll.u32 %s304_s15, 4 }
  0x8b   : > { %306 = vsyncadd %s1341_s29, %s305_s30  ;;  %p1344_p3 = scmp.ne.s32.totalorder %s815_s7, 0  ;;  %s817_s9 = sshll.u32 %s1104_s19, 5 }
  0x8c   : > { %s311_s13 = scalar_lea.hbm %s1522_s3, %s817_s9  ;;  %s1352_s8 = sshll.u32 %s296_s28, 4  ;;  %s316_s8 = int_to_ptr.vmem [resolvable:$true] %s1352_s8 }
  0x8d   : > { %s313_s5 = sshll.u32 %s311_s13, 4  ;;  %s792_s25 = sshll.u32 %s1560_s6, 8  ;;  %s1355_s5 = int_to_ptr.hbm [resolvable:$true] %s313_s5 }
  0x8e   : > { %s1011_s23 = sshra.s32 %s1355_s5, 4  ;;  %s1013_s14 = sshrl.u32 %s792_s25, 4  ;;  %s1012_s23 = int_to_ptr.hbm [resolvable:$true] %s1011_s23 }
  0x8f   : > { %s1018_s12 = scalar_lea.hbm %s1012_s23, %s1013_s14  ;;  %s1022_s30 = scalar_lea.hbm %s1522_s3, 80 }
  0x90   : > { %p1019_p10 = scmp.ne.s32.totalorder %s1012_s23, %s1018_s12  ;;  %p1024_p13 = scmp.lt.s32.totalorder %s1022_s30, %s1018_s12 }
  0x92   : > { %p1020_p11 = pnand %p1019_p10, %p1344_p3 }
  0x94   : > { %p1021_p12 = pneg %p1020_p11 }
  0x96   : > { %p1026_p0 = pnand %p1024_p13, %p1021_p12 }
  0x98   : > { %1029 = shalt.err (!%p1026_p0)
}
  0x99   : > { %s1030_s28 = sshra.s32 %s316_s8, 4  ;;  %s1119_s11 = smov [#allocation7]   ;;  %s1031_s28 = int_to_ptr.vmem [resolvable:$true] %s1030_s28 }
  0x9a   : > { %s1037_s9 = scalar_lea.vmem %s1031_s28, %s1013_s14  ;;  %s1041_s10 = scalar_lea.vmem %s1119_s11, 64 }
  0x9b   : > { %p1038_p1 = scmp.ne.s32.totalorder %s1031_s28, %s1037_s9  ;;  %p1043_p5 = scmp.lt.s32.totalorder %s1041_s10, %s1037_s9 }
  0x9d   : > { %p1039_p2 = pnand %p1038_p1, %p1344_p3 }
  0x9f   : > { %p1040_p4 = pneg %p1039_p2 }
  0xa1   : > { %p1045_p6 = pnand %p1043_p5, %p1040_p4 }
  0xa3   : > { %1048 = shalt.err (!%p1045_p6)
}
  0xa4   : > { %s1120_s13 = smov 256   ;;  %s1121_s23 = smov 16  }
  0xa5   : > { %321 = dma.hbm_to_vmem [thread:$0]  (%p1344_p3), %s1355_s5, %s792_s25, %s316_s8, %s1341_s29, %s1120_s13, %s1120_s13, %s1121_s23  }
  0xa6 PF: > { %p793_p8 = scmp.ge.s32.totalorder %s1108_s20, 1  ;;  %p323_p9 = scmp.lt.s32.totalorder %s1108_s20, 4 }
  0xa8   : > { %p324_p10 = pnand %p793_p8, %p323_p9 }
  0xa9   : > { %s329_s14 = sand.u32 (!%p324_p10), 1, %s1092_s16  }
  0xaa   : > { %327 = sbr.rel (%p324_p10) target bundleno = 360 (0x168), region = 36  ;;  %s794_s12 = sshll.u32 (!%p324_p10), %s329_s14, 5 }
  0xab   : > { %s330_s7 = scalar_lea.sflag (!%p324_p10), [#allocation3], %s329_s14  ;;  %s1381_s15 = scalar_lea.vmem (!%p324_p10), [#allocation2], %s794_s12 }
  0xaf   : > { %1075 = dma.done.wait (%p1192_p7), %s330_s7, 512  }
  0xb0   : > { %1077 = vsyncadd (%p1192_p7), %s330_s7, 4294966784  ;;  %s339_s6 = sand.u32 1, %s753_s21   ;;  %s1389_s24 = scalar_lea.vmem [#allocation4], %s794_s12 }
  0xb1   : > { %s340_s29 = scalar_lea.sflag [#allocation5], %s339_s6 }
  0xb2   : > { %1079 = dma.done.wait (%p1192_p7), %s340_s29, 1024  }
  0xb3   : > { %1081 = vsyncadd (%p1192_p7), %s340_s29, 4294966272  ;;  %s1395_s8 = scalar_lea.vmem [#allocation6], %s794_s12  ;;  %s360_s5 = scalar_lea.sflag [#allocation8], %s329_s14 }
  0xb4   : > { %s363_s25 = scalar_lea.vmem [#allocation7], %s794_s12 }
  0xb5   : > { %1083 = dma.done.wait (%p1192_p7), %s360_s5, 512  }
  0xb6   : > { %1085 = vsyncadd (%p1192_p7), %s360_s5, 4294966784  ;;  %v441_v0 = vld [vmem:[%s1381_s15] sm:$0xff]  ;;  %v442_v1 = vld [vmem:[%s1381_s15 + $0x8] sm:$0xff]  ;;  %v561_v11 = vlaneseq  ;;  %s803_s21 = sshll.u32 %s1100_s18, 4  ;;  %p434_p7 = scmp.lt.s32.totalorder %s1100_s18, 2 }
  0xb7   : > { %v449_v2 = vld [vmem:[%s1395_s8] sm:$0xff]  ;;  %v450_v3 = vld [vmem:[%s1395_s8 + $0x8] sm:$0xff]  ;;  %v455_v9 = vld [vmem:[%s363_s25 + $0x10] sm:$0xff]  ;;  %v565_v25 = vstv %s803_s21 }
  0xb8   : > { %v453_v4 = vld [vmem:[%s363_s25] sm:$0xff]  ;;  %v454_v5 = vld [vmem:[%s363_s25 + $0x8] sm:$0xff]  ;;  %v513_v6 = vsub.f32 %v441_v0, %v449_v2  ;;  %v514_v7 = vsub.f32 %v442_v1, %v450_v3  ;;  %v1410_v12 = vld [vmem:[%s363_s25 + $0x18] sm:$0xff]  ;;  %v1418_v22 = vshrl.u32 %v561_v11, 7  ;;  %vm490_vm5 = vweird.f32 %v455_v9  ;;  %s1562_s18 = smov (!%p434_p7, %s1100_s18), 2 }
  0xb9   : > { %878 = vrcp.f32 %v453_v4  ;;  %v1406_v8 = vld [vmem:[%s1389_s24] sm:$0xff]  ;;  %v1413_v13 = vld [vmem:[%s1389_s24 + $0x8] sm:$0xff]  ;;  %v466_v14 = vand.u32 2147483647, %v453_v4  ;;  %v468_v15 = vand.u32 2147483648, %v453_v4  ;;  %v482_v17 = vand.u32 2147483648, %v454_v5 }
  0xba   : > { %880 = vrcp.f32 %v454_v5  ;;  %v517_v10 = vmul.f32 %v1406_v8, %v1406_v8  ;;  %v480_v16 = vand.u32 2147483647, %v454_v5  ;;  %v518_v18 = vmul.f32 %v1413_v13, %v1413_v13  ;;  %v443_v34 = vld [vmem:[%s1381_s15 + $0x10] sm:$0xff]  ;;  %v444_v37 = vld [vmem:[%s1381_s15 + $0x18] sm:$0xff]  ;;  %s798_s26 = sshll.u32 %s1562_s18, 3 }
  0xbb   : > { %882 = vrcp.f32 %v455_v9  ;;  %v521_v19 = vmul.f32 %v513_v6, %v513_v6  ;;  %v522_v20 = vmul.f32 %v514_v7, %v514_v7  ;;  %vm462_vm0 = vweird.f32 %v453_v4  ;;  %v451_v38 = vld [vmem:[%s1395_s8 + $0x10] sm:$0xff]  ;;  %v452_v39 = vld [vmem:[%s1395_s8 + $0x18] sm:$0xff]  ;;  %s440_s9 = scalar_lea.vmem %s1523_s4, %s798_s26 }
  0xbc   : > { %884 = vrcp.f32 %v1410_v12  ;;  %vm476_vm1 = vweird.f32 %v454_v5  ;;  %vm1420_vm2 = vcmp.eq.f32.partialorder %v466_v14, 8.507059e+37  ;;  %v469_v26 = vor.u32 1.1754944e-38, %v468_v15  ;;  %v447_v1 = vld [vmem:[%s1389_s24 + $0x10] sm:$0xff]  ;;  %v448_v14 = vld [vmem:[%s1389_s24 + $0x18] sm:$0xff] }
  0xbd   : > { %vm1424_vm3 = vcmp.eq.f32.partialorder %v480_v16, 8.507059e+37  ;;  %v483_v29 = vor.u32 1.1754944e-38, %v482_v17  ;;  %v1428_v30 = vadd.f32 %v521_v19, %v517_v10  ;;  %v1430_v31 = vadd.f32 %v522_v20, %v518_v18 }
  0xbe   : > { %v494_v35 = vand.u32 2147483647, %v455_v9  ;;  %v496_v41 = vand.u32 2147483648, %v455_v9  ;;  %vm504_vm7 = vweird.f32 %v1410_v12  ;;  %v508_v44 = vand.u32 2147483647, %v1410_v12 }
  0xbf   : > { %v879_v21 = vpop.eup %878  ;;  %v510_v45 = vand.u32 2147483648, %v1410_v12  ;;  %v515_v53 = vsub.f32 %v443_v34, %v451_v38  ;;  %v516_v54 = vsub.f32 %v444_v37, %v452_v39  ;;  %v520_v17 = vmul.f32 %v448_v14, %v448_v14 }
  0xc0   : > { %v881_v23 = vpop.eup %880  ;;  %v458_v24 = vmul.f32 %v879_v21, %v453_v4  ;;  %vm463_vm4 = vweird.f32 %v879_v21  ;;  %vm1452_vm11 = vcmp.eq.f32.partialorder %v494_v35, 8.507059e+37  ;;  %v497_v60 = vor.u32 1.1754944e-38, %v496_v41 }
  0xc1   : > { %v472_v28 = vmul.f32 %v881_v23, %v454_v5  ;;  %v883_v32 = vpop.eup %882  ;;  %vm477_vm6 = vweird.f32 %v881_v23  ;;  %vm1441_vm8 = vmor %vm462_vm0, %vm463_vm4  ;;  %vm1463_vm14 = vcmp.eq.f32.partialorder %v508_v44, 8.507059e+37  ;;  %v511_v62 = vor.u32 1.1754944e-38, %v510_v45 }
  0xc2   : > { %v459_v33 = vsub.f32 1.0, %v458_v24  ;;  %v486_v40 = vmul.f32 %v883_v32, %v455_v9  ;;  %v885_v42 = vpop.eup %884  ;;  %vm491_vm9 = vweird.f32 %v883_v32  ;;  %vm1448_vm10 = vmor %vm476_vm1, %vm477_vm6  ;;  %v519_v9 = vmul.f32 %v447_v1, %v447_v1 }
  0xc3   : > { %v473_v36 = vsub.f32 1.0, %v472_v28  ;;  %v500_v49 = vmul.f32 %v885_v42, %v1410_v12  ;;  %vm505_vm12 = vweird.f32 %v885_v42  ;;  %vm1459_vm13 = vmor %vm490_vm5, %vm491_vm9  ;;  %v523_v12 = vmul.f32 %v515_v53, %v515_v53 }
  0xc4   : > { %v460_v43 = vmul.f32 %v879_v21, %v459_v33  ;;  %v487_v48 = vsub.f32 1.0, %v486_v40  ;;  %vm1477_vm15 = vmor %vm504_vm7, %vm505_vm12  ;;  %v566_v35 = vadd.s32 %v565_v25, %v1418_v22  ;;  %v563_v40 = vadd.s32 8, %v1418_v22 }
  0xc5   : > { %v474_v47 = vmul.f32 %v881_v23, %v473_v36  ;;  %v501_v57 = vsub.f32 1.0, %v500_v49 }
  0xc6   : > { %v461_v50 = vadd.f32 %v879_v21, %v460_v43  ;;  %v488_v56 = vmul.f32 %v883_v32, %v487_v48  ;;  %vm568_vm0 = vcmp.lt.s32.totalorder %v566_v35, 40  ;;  %v567_v49 = vadd.s32 %v565_v25, %v563_v40 }
  0xc7   : > { %v475_v55 = vadd.f32 %v881_v23, %v474_v47  ;;  %v502_v3 = vmul.f32 %v885_v42, %v501_v57 }
  0xc8   : > { %v465_v58 = vsel %vm1441_vm8, %v879_v21, %v461_v50  ;;  %v489_v2 = vadd.f32 %v883_v32, %v488_v56  ;;  %vm569_vm1 = vcmp.lt.s32.totalorder %v567_v49, 40 }
  0xc9   : > { %v470_v63 = vsel %vm1420_vm2, %v469_v26, %v465_v58  ;;  %v479_v0 = vsel %vm1448_vm10, %v881_v23, %v475_v55  ;;  %v503_v16 = vadd.f32 %v885_v42, %v502_v3  ;;  %v524_v23 = vmul.f32 %v516_v54, %v516_v54 }
  0xca   : > { %v484_v4 = vsel %vm1424_vm3, %v483_v29, %v479_v0  ;;  %v529_v5 = vmul.f32 %v470_v63, %v470_v63  ;;  %v541_v6 = vmul.f32 %v470_v63, %v1406_v8  ;;  %v493_v15 = vsel %vm1459_vm13, %v883_v32, %v489_v2 }
  0xcb   : > { %v530_v10 = vmul.f32 %v484_v4, %v484_v4  ;;  %v542_v11 = vmul.f32 %v484_v4, %v1413_v13  ;;  %v498_v8 = vsel %vm1452_vm11, %v497_v60, %v493_v15  ;;  %v507_v19 = vsel %vm1477_vm15, %v885_v42, %v503_v16 }
  0xcc   : > { %886 = vlog2.f32 %v541_v6  ;;  %v533_v18 = vmul.f32 0.5, %v529_v5  ;;  %v531_v20 = vmul.f32 %v498_v8, %v498_v8  ;;  %v512_v13 = vsel %vm1463_vm14, %v511_v62, %v507_v19 }
  0xcd   : > { %888 = vlog2.f32 %v542_v11  ;;  %v534_v21 = vmul.f32 0.5, %v530_v10  ;;  %v543_v24 = vmul.f32 %v498_v8, %v447_v1  ;;  %v532_v26 = vmul.f32 %v512_v13, %v512_v13 }
  0xce   : > { %v544_v27 = vmul.f32 %v512_v13, %v448_v14  ;;  %v537_v28 = vmul.f32 %v533_v18, %v1428_v30  ;;  %v527_v29 = vadd.f32 %v523_v12, %v519_v9  ;;  %v535_v32 = vmul.f32 0.5, %v531_v20 }
  0xcf   : > { %890 = vlog2.f32 %v543_v24  ;;  %v538_v34 = vmul.f32 %v534_v21, %v1430_v31  ;;  %v528_v36 = vadd.f32 %v524_v23, %v520_v17  ;;  %v536_v37 = vmul.f32 0.5, %v532_v26 }
  0xd0   : > { %892 = vlog2.f32 %v544_v27  ;;  %v539_v43 = vmul.f32 %v535_v32, %v527_v29 }
  0xd1   : > { %v540_v30 = vmul.f32 %v536_v37, %v528_v36 }
  0xd2   : > { %v887_v33 = vpop.eup %886 }
  0xd3   : > { %v889_v38 = vpop.eup %888  ;;  %v546_v39 = vmul.f32 0.6931472, %v887_v33 }
  0xd4   : > { %v548_v41 = vmul.f32 0.6931472, %v889_v38 }
  0xd5   : > { %v553_v42 = vsub.f32 %v537_v28, %v546_v39  ;;  %v891_v44 = vpop.eup %890 }
  0xd6   : > { %v554_v45 = vsub.f32 %v538_v34, %v548_v41  ;;  %v893_v46 = vpop.eup %892  ;;  %v550_v48 = vmul.f32 0.6931472, %v891_v44 }
  0xd7   : > { %v799_v47 = vadd.f32 -0.5, %v553_v42  ;;  %v552_v50 = vmul.f32 0.6931472, %v893_v46 }
  0xd8   : > { %v800_v31 = vadd.f32 -0.5, %v554_v45  ;;  %v555_v52 = vsub.f32 %v539_v43, %v550_v48 }
  0xd9   : > { %v574_v51 = vsel %vm568_vm0, %v799_v47, 0.0  ;;  %v556_v54 = vsub.f32 %v540_v30, %v552_v50 }
  0xda   : > { %v575_v53 = vsel %vm568_vm0, %v800_v31, 0.0  ;;  %v801_v55 = vadd.f32 -0.5, %v555_v52 }
  0xdb   : > { %v578_v22 = vadd.f32 %v575_v53, %v574_v51  ;;  %v802_v56 = vadd.f32 -0.5, %v556_v54 }
  0xdc   : > { %v576_v57 = vsel %vm569_vm1, %v801_v55, 0.0 }
  0xdd   : > { %579 = vadd.xlane.f32.xlu0 %v578_v22  ;;  %v577_v58 = vsel %vm569_vm1, %v802_v56, 0.0 }
  0xde   : > { %v581_v59 = vadd.f32 %v577_v58, %v576_v57 }
  0xe5   : > { %582 = vadd.xlane.f32.xlu0 %v581_v59 }
 0x150   : > { %v580_v60 = vpop.xlane.xlu0 %579 }
 0x158   : > { %v583_v61 = vpop.xlane.xlu0 %582 }
 0x159   : > { %v584_v62 = vadd.f32 %v583_v61, %v580_v60 }
 0x15b   : > { %v585_v63 = vrot.slane %v584_v62, 4 }
 0x15d   : > { %v586_v0 = vadd.f32 %v585_v63, %v584_v62 }
 0x15f   : > { %v587_v1 = vrot.slane %v586_v0, 2 }
 0x161   : > { %v588_v2 = vadd.f32 %v587_v1, %v586_v0 }
 0x163   : > { %v589_v3 = vrot.slane %v588_v2, 1 }
 0x165   : > { %v590_v4 = vadd.f32 %v589_v3, %v588_v2 }
 0x167   : > { %591 = vst [vmem:[%s440_s9] sm:$0xff] %v590_v4 }
 0x168 PF: > { %s23_s20 = sadd.s32 1, %s1108_s20   ;;  %s1546_s15 = smov %s1092_s16 }
 0x169   : > { %p20_p3 = scmp.ge.s32.totalorder %s23_s20, 5   ;;  %s1547_s16 = smov %s1096_s17 }
 0x16a   : > { %s1548_s17 = smov %s1197_s27  ;;  %s1549_s18 = smov %s1104_s19 }
 0x16b   : > { %s1550_s19 = smov %s1552_s22  ;;  %22 = sbr.rel (!%p20_p3) target bundleno = 8 (0x8), region = 113 }
 0x170   :  { %617 = vsyncpa [#allocation3], 1 }
 0x171   :  { %619 = vsyncpa [#allocation3 + $0x1], 1 }
 0x172   :  { %620 = vsyncpa [#allocation5], 1 }
 0x173   :  { %622 = vsyncpa [#allocation5 + $0x1], 1 }
 0x174   :  { %623 = vsyncpa [#allocation8], 1 }
 0x175   :  { %625 = vsyncpa [#allocation8 + $0x1], 1 }

</bundles_post_ra>
